<compile_context>
chip_gen: v5e
topology: v5e:2x2
jax: 0.10.0
libtpu: 0.0.40
codegen_flags: <defaults>
</compile_context>

<pallas_src>
import functools

import jax
import jax.numpy as jnp
from jax.experimental import pallas as pl
from jax.experimental.pallas import tpu as pltpu

_LANE = 128


def _cdiv(a, b):
    return -(-a // b)


def _round_up(a, b):
    return _cdiv(a, b) * b


def _num_tensorcores():
    """2 on dual-TensorCore chips (v7x), 1 on v5e/v6e/others."""
    try:
        kind = jax.devices()[0].device_kind.lower()
    except Exception:
        return 1
    if ("v7" in kind) or ("7x" in kind) or ("tpu7" in kind):
        return 2
    return 1


def _rmse_partial_kernel(y_ref, yhat_ref, o_ref, acc_ref, *,
                         m_rows, tile_m, tiles_per_split):
    s = pl.program_id(0)   # TensorCore split (core-parallel on v7x)
    i = pl.program_id(1)   # reduction step within the split (arbitrary axis)

    @pl.when(i == 0)
    def _init():
        acc_ref[...] = jnp.zeros_like(acc_ref)   # single (8,128) vreg

    # Upcast in-register; inputs stream through HBM in their native dtype.
    d = y_ref[...].astype(jnp.float32) - yhat_ref[...].astype(jnp.float32)
    sq = d * d

    n_sub = tile_m // 8   # number of f32 vregs stacked along sublanes

    # Global (unclamped) tile index -> first row covered by this tile.
    t = s * tiles_per_split + i
    row_start = t * tile_m
    is_partial = row_start + tile_m > m_rows

    @pl.when(jnp.logical_not(is_partial))
    def _accumulate_full():
        # Pure VPU tree-reduce down to one vreg, then a single accumulate:
        # ~2 VMEM ops per processed vreg (2 input vld) instead of 4.
        acc_ref[...] += sq.reshape(n_sub, 8, _LANE).sum(axis=0)

    @pl.when(is_partial)
    def _accumulate_masked():
        rows = jax.lax.broadcasted_iota(jnp.int32, sq.shape, 0) + row_start
        msq = jnp.where(rows < m_rows, sq, 0.0)
        acc_ref[...] += msq.reshape(n_sub, 8, _LANE).sum(axis=0)

    @pl.when(i == pl.num_programs(1) - 1)
    def _finalize():
        # Single (8,128) cross-lane/sublane reduce per split.
        o_ref[0, 0] = jnp.sum(acc_ref[...])


def rmse_loss(y, y_hat, coeff=1):
    """Pallas implementation of rmseLoss.forward (coeff unused, as in PyTorch)."""
    assert y.shape == y_hat.shape, "y and y_hat must have the same shape"
    n_elems = int(y.size)

    dt = jnp.result_type(y.dtype, y_hat.dtype)
    yf = y.reshape(-1).astype(dt)          # no-op cast when dtypes already match
    yhf = y_hat.reshape(-1).astype(dt)

    itemsize = jnp.dtype(dt).itemsize
    sublane = max(8, 32 // max(itemsize, 1))   # 8 f32, 16 bf16/f16, 32 int8/fp8

    # The (rows, 128) view needs the flat length to be a multiple of 128.  The
    # zero pad (usually a no-op) contributes 0 to the sum of squares; the mean
    # still divides by the original n_elems.
    pad = (-n_elems) % _LANE
    if pad:
        yf = jnp.pad(yf, (0, pad))
        yhf = jnp.pad(yhf, (0, pad))

    m = yf.size // _LANE
    yf = yf.reshape(m, _LANE)
    yhf = yhf.reshape(m, _LANE)

    nsplit = _num_tensorcores()   # 2 only on v7x; 1 on single-TC chips
    # ~2 MiB of each input per grid step (4 MiB on v7x, whose 3.2 TB/s HBM
    # makes the per-step overhead a large fraction at small steps).
    tile_bytes = (4 << 20) if nsplit == 2 else (2 << 20)
    tile_m_cap = max(sublane,
                     (tile_bytes // (_LANE * itemsize)) // sublane * sublane)

    rows_per_split = _cdiv(m, nsplit)
    tile_m = min(tile_m_cap, _round_up(rows_per_split, sublane))
    total_tiles = _cdiv(m, tile_m)
    tiles_per_split = _cdiv(total_tiles, nsplit)

    def in_index(s, i):
        # Clamp so a (rare, v7x-only) trailing dead tile maps to a valid
        # block; its contribution is masked to zero inside the kernel.
        t = s * tiles_per_split + i
        return (jnp.minimum(t, total_tiles - 1), 0)

    block = (tile_m, _LANE)
    kernel = functools.partial(
        _rmse_partial_kernel,
        m_rows=m, tile_m=tile_m, tiles_per_split=tiles_per_split)
    cost = pl.CostEstimate(flops=3 * n_elems, transcendentals=0,
                           bytes_accessed=2 * n_elems * itemsize + 4 * nsplit)

    def build_and_run(split_sem, pipeline_mode):
        spec_kwargs = {} if pipeline_mode is None else {"pipeline_mode": pipeline_mode}
        in_spec = pl.BlockSpec(block, in_index, **spec_kwargs)
        return pl.pallas_call(
            kernel,
            out_shape=jax.ShapeDtypeStruct((nsplit, 1), jnp.float32),
            grid_spec=pltpu.PrefetchScalarGridSpec(
                num_scalar_prefetch=0,
                grid=(nsplit, tiles_per_split),
                in_specs=[in_spec, in_spec],
                out_specs=pl.BlockSpec(
                    (1, 1), lambda s, i: (s, 0), memory_space=pltpu.SMEM),
                scratch_shapes=[pltpu.VMEM((8, _LANE), jnp.float32)],
            ),
            compiler_params=pltpu.CompilerParams(
                dimension_semantics=(split_sem, pltpu.ARBITRARY),
                vmem_limit_bytes=32 * 1024 * 1024),
            cost_estimate=cost,
        )(yf, yhf)

    # Preferred config: core-parallel split (v7x) + triple-buffered inputs.
    if nsplit > 1:
        preferred_sem = getattr(pltpu, "CORE_PARALLEL", pltpu.PARALLEL)
    else:
        preferred_sem = pltpu.ARBITRARY
    buffered = getattr(pl, "Buffered", None)
    preferred_pm = buffered(3) if buffered is not None else None

    try:
        partials = build_and_run(preferred_sem, preferred_pm)
    except Exception:
        # Conservative fallback: default double-buffering, plain parallel split.
        fallback_sem = pltpu.PARALLEL if nsplit > 1 else pltpu.ARBITRARY
        partials = build_and_run(fallback_sem, None)

    total = jnp.sum(partials)
    return jnp.sqrt(total / jnp.float32(n_elems)).astype(dt)


if __name__ == "__main__":
    key = jax.random.PRNGKey(0)
    k1, k2 = jax.random.split(key)

    # Small NCHW-shaped example inputs, consistent with a typical use of the loss.
    x_shape = (2, 4, 16, 16)
    y = jax.random.normal(k1, x_shape, dtype=jnp.float32)
    y_hat = jax.random.normal(k2, x_shape, dtype=jnp.float32)

    loss = jax.block_until_ready(rmse_loss(y, y_hat))

    # Sanity check against plain JAX.
    ref = jnp.sqrt(jnp.mean(jnp.square(y - y_hat)))
    assert jnp.allclose(loss, ref, rtol=1e-5, atol=1e-6), (loss, ref)

    print("KERNEL_OK")
</pallas_src>

<mosaic_0001>
module attributes {stable_mosaic.version = 11 : i64} {
  func.func @_rmse_partial_kernel(%arg0: i32, %arg1: i32, %arg2: memref<16x128xf32, #tpu.memory_space<vmem>>, %arg3: memref<16x128xf32, #tpu.memory_space<vmem>>, %arg4: memref<1x1xf32, #tpu.memory_space<smem>>, %arg5: memref<8x128xf32, #tpu.memory_space<vmem>>) attributes {dimension_semantics = [#tpu.dimension_semantics<arbitrary>, #tpu.dimension_semantics<arbitrary>], iteration_bounds = array<i64: 1, 1>, scalar_prefetch = 0 : i64, scratch_operands = 1 : i64, tpu.core_type = #tpu.core_type<tc>, window_params = [{transform_indices = @transform_0, window_bounds = array<i64: 16, 128>}, {transform_indices = @transform_1, window_bounds = array<i64: 16, 128>}, {transform_indices = @transform_2, window_bounds = array<i64: 1, 1>}]} {
    %c0_i32 = arith.constant 0 : i32
    %0 = arith.cmpi eq, %arg1, %c0_i32 : i32
    %1 = arith.extui %0 : i1 to i32
    %c0_i32_0 = arith.constant 0 : i32
    %2 = arith.cmpi ne, %1, %c0_i32_0 : i32
    scf.if %2 {
      %cst = arith.constant 0.000000e+00 : f32
      %20 = vector.broadcast %cst : f32 to vector<8x128xf32>
      %c0_10 = arith.constant 0 : index
      %c0_11 = arith.constant 0 : index
      %21 = vector.load %arg5[%c0_10, %c0_11] : memref<8x128xf32, #tpu.memory_space<vmem>>, vector<8x128xf32>
      tpu.vector_store %arg5[%c0_10, %c0_11], %20 {strides = array<i32>} : memref<8x128xf32, #tpu.memory_space<vmem>>, vector<8x128xf32>,
    } else {
    }
    %c0 = arith.constant 0 : index
    %c0_1 = arith.constant 0 : index
    %3 = vector.load %arg2[%c0, %c0_1] : memref<16x128xf32, #tpu.memory_space<vmem>>, vector<16x128xf32>
    %c0_2 = arith.constant 0 : index
    %c0_3 = arith.constant 0 : index
    %4 = vector.load %arg3[%c0_2, %c0_3] : memref<16x128xf32, #tpu.memory_space<vmem>>, vector<16x128xf32>
    %5 = arith.subf %3, %4 : vector<16x128xf32>
    %6 = arith.mulf %5, %5 : vector<16x128xf32>
    %c1_i32 = arith.constant 1 : i32
    %7 = arith.muli %arg0, %c1_i32 : i32
    %8 = arith.addi %7, %arg1 : i32
    %c16_i32 = arith.constant 16 : i32
    %9 = arith.muli %8, %c16_i32 : i32
    %c16_i32_4 = arith.constant 16 : i32
    %10 = arith.addi %9, %c16_i32_4 : i32
    %c16_i32_5 = arith.constant 16 : i32
    %11 = arith.cmpi sgt, %10, %c16_i32_5 : i32
    %true = arith.constant true
    %12 = arith.xori %11, %true : i1
    %13 = arith.extui %12 : i1 to i32
    %c0_i32_6 = arith.constant 0 : i32
    %14 = arith.cmpi ne, %13, %c0_i32_6 : i32
    scf.if %14 {
      %c0_10 = arith.constant 0 : index
      %c0_11 = arith.constant 0 : index
      %20 = vector.load %arg5[%c0_10, %c0_11] : memref<8x128xf32, #tpu.memory_space<vmem>>, vector<8x128xf32>
      %21 = vector.shape_cast %6 : vector<16x128xf32> to vector<2x8x128xf32>
      %cst = arith.constant dense<0.000000e+00> : vector<8x128xf32>
      %22 = vector.multi_reduction <add>, %21, %cst [0] : vector<2x8x128xf32> to vector<8x128xf32>
      %23 = arith.addf %20, %22 : vector<8x128xf32>
      %c0_12 = arith.constant 0 : index
      %c0_13 = arith.constant 0 : index
      %24 = vector.load %arg5[%c0_12, %c0_13] : memref<8x128xf32, #tpu.memory_space<vmem>>, vector<8x128xf32>
      tpu.vector_store %arg5[%c0_12, %c0_13], %23 {strides = array<i32>} : memref<8x128xf32, #tpu.memory_space<vmem>>, vector<8x128xf32>,
    } else {
    }
    %15 = arith.extui %11 : i1 to i32
    %c0_i32_7 = arith.constant 0 : i32
    %16 = arith.cmpi ne, %15, %c0_i32_7 : i32
    scf.if %16 {
      %20 = tpu.iota {dimensions = array<i32: 0>} : vector<16x128xi32>
      %21 = vector.broadcast %9 : i32 to vector<16x128xi32>
      %22 = arith.addi %20, %21 : vector<16x128xi32>
      %c16_i32_10 = arith.constant 16 : i32
      %23 = vector.broadcast %c16_i32_10 : i32 to vector<16x128xi32>
      %24 = arith.cmpi slt, %22, %23 : vector<16x128xi32>
      %cst = arith.constant 0.000000e+00 : f32
      %25 = vector.broadcast %cst : f32 to vector<16x128xf32>
      %26 = arith.select %24, %6, %25 : vector<16x128xi1>, vector<16x128xf32>
      %c0_11 = arith.constant 0 : index
      %c0_12 = arith.constant 0 : index
      %27 = vector.load %arg5[%c0_11, %c0_12] : memref<8x128xf32, #tpu.memory_space<vmem>>, vector<8x128xf32>
      %28 = vector.shape_cast %26 : vector<16x128xf32> to vector<2x8x128xf32>
      %cst_13 = arith.constant dense<0.000000e+00> : vector<8x128xf32>
      %29 = vector.multi_reduction <add>, %28, %cst_13 [0] : vector<2x8x128xf32> to vector<8x128xf32>
      %30 = arith.addf %27, %29 : vector<8x128xf32>
      %c0_14 = arith.constant 0 : index
      %c0_15 = arith.constant 0 : index
      %31 = vector.load %arg5[%c0_14, %c0_15] : memref<8x128xf32, #tpu.memory_space<vmem>>, vector<8x128xf32>
      tpu.vector_store %arg5[%c0_14, %c0_15], %30 {strides = array<i32>} : memref<8x128xf32, #tpu.memory_space<vmem>>, vector<8x128xf32>,
    } else {
    }
    %c0_i32_8 = arith.constant 0 : i32
    %17 = arith.cmpi eq, %arg1, %c0_i32_8 : i32
    %18 = arith.extui %17 : i1 to i32
    %c0_i32_9 = arith.constant 0 : i32
    %19 = arith.cmpi ne, %18, %c0_i32_9 : i32
    scf.if %19 {
      %c0_10 = arith.constant 0 : index
      %c0_11 = arith.constant 0 : index
      %20 = vector.load %arg5[%c0_10, %c0_11] : memref<8x128xf32, #tpu.memory_space<vmem>>, vector<8x128xf32>
      %21 = vector.shape_cast %20 : vector<8x128xf32> to vector<1x8x128xf32>
      %cst = arith.constant dense<0.000000e+00> : vector<1xf32>
      %22 = vector.multi_reduction <add>, %21, %cst [1, 2] : vector<1x8x128xf32> to vector<1xf32>
      %23 = vector.shape_cast %22 : vector<1xf32> to vector<1x1x1xf32>
      %24 = vector.extract %23[0, 0, 0] : f32 from vector<1x1x1xf32>
      %c0_12 = arith.constant 0 : index
      %c0_13 = arith.constant 0 : index
      %25 = memref.load %arg4[%c0_12, %c0_13] : memref<1x1xf32, #tpu.memory_space<smem>>
      memref.store %24, %arg4[%c0_12, %c0_13] : memref<1x1xf32, #tpu.memory_space<smem>>
    } else {
    }
    return
  }
  func.func @transform_0(%arg0: i32, %arg1: i32) -> (i32, i32) {
    %c1_i32 = arith.constant 1 : i32
    %0 = arith.muli %arg0, %c1_i32 : i32
    %1 = arith.addi %0, %arg1 : i32
    %c0_i32 = arith.constant 0 : i32
    %2 = arith.minsi %1, %c0_i32 : i32
    %c0_i32_0 = arith.constant 0 : i32
    %c0_i32_1 = arith.constant 0 : i32
    return %2, %c0_i32_0 : i32, i32
  }
  func.func @transform_1(%arg0: i32, %arg1: i32) -> (i32, i32) {
    %c1_i32 = arith.constant 1 : i32
    %0 = arith.muli %arg0, %c1_i32 : i32
    %1 = arith.addi %0, %arg1 : i32
    %c0_i32 = arith.constant 0 : i32
    %2 = arith.minsi %1, %c0_i32 : i32
    %c0_i32_0 = arith.constant 0 : i32
    %c0_i32_1 = arith.constant 0 : i32
    return %2, %c0_i32_0 : i32, i32
  }
  func.func @transform_2(%arg0: i32, %arg1: i32) -> (i32, i32) {
    %c0_i32 = arith.constant 0 : i32
    %c0_i32_0 = arith.constant 0 : i32
    return %arg0, %c0_i32 : i32, i32
  }
}

</mosaic_0001>

<bundles_post_ra>
// kernel: tpu_custom_call.1
= control target key start
LH: loop header
LB: loop body
LE: loop exit
PB: predicated region body
PF: predicated region fallthrough
CT: control target
= control target key end

     0   :  { %7 = vsyncpa [#allocation4], 0  ;;  %s244_s0 = inlined_call_operand.hbm [shape: f32[16,128], index: 0, kind: input, shape index: {}]   ;;  %s245_s1 = inlined_call_operand.hbm [shape: f32[16,128], index: 1, kind: input, shape index: {}]   ;;  %s246_s2 = inlined_call_operand.hbm [shape: f32[1,1], index: 2, kind: output, shape index: {}]  }
   0x1   :  { %8 = vsyncpa [#allocation7], 0 }
   0x2   :  { %9 = vsyncpa [#allocation5], 0  ;;  %s20_s11 = sshll.u32 %s244_s0, 4  ;;  %s215_s12 = smov [#allocation3]   ;;  %s21_s11 = int_to_ptr.hbm [resolvable:$true] %s20_s11 }
   0x3   :  { %s22_s13 = sshll.u32 %s215_s12, 4  ;;  %s39_s16 = sshll.u32 %s245_s1, 4  ;;  %s23_s13 = int_to_ptr.vmem [resolvable:$true] %s22_s13  ;;  %s40_s16 = int_to_ptr.hbm [resolvable:$true] %s39_s16 }
   0x4   :  { %s216_s17 = smov 128   ;;  %s217_s18 = smov 8  }
   0x5   :  { %28 = dma.hbm_to_vmem [thread:$0]  %s21_s11, 256, %s23_s13, [#allocation4], %s216_s17, %s216_s17, %s217_s18  }
   0x6   :  { %s218_s19 = smov [#allocation6]  }
   0x7   :  { %s41_s20 = sshll.u32 %s218_s19, 4  ;;  %s42_s20 = int_to_ptr.vmem [resolvable:$true] %s41_s20 }
   0x8   :  { %47 = dma.hbm_to_vmem [thread:$0]  %s40_s16, 256, %s42_s20, [#allocation7], %s216_s17, %s216_s17, %s217_s18  }
   0x9   :  { %209 = dma.done.wait [#allocation4], 256  }
   0xa   :  { %210 = vsyncadd [#allocation4], 4294967040 }
   0xb   :  { %211 = dma.done.wait [#allocation7], 256  }
   0xc   :  { %212 = vsyncadd [#allocation7], 4294967040  ;;  %v69_v0 = vld [vmem:[#allocation3] sm:$0xff]  ;;  %v70_v1 = vld [vmem:[#allocation3 + $0x8] sm:$0xff]  ;;  %s126_s21 = sshll.u32 %s246_s2, 4  ;;  %s219_s23 = smov [#allocation8]   ;;  %s127_s21 = int_to_ptr.hbm [resolvable:$true] %s126_s21 }
   0xd   :  { %v71_v2 = vld [vmem:[#allocation6] sm:$0xff]  ;;  %v72_v3 = vld [vmem:[#allocation6 + $0x8] sm:$0xff] }
   0xe   :  { %v73_v4 = vsub.f32 %v69_v0, %v71_v2  ;;  %v74_v5 = vsub.f32 %v70_v1, %v72_v3 }
  0x10   :  { %v75_v6 = vmul.f32 %v73_v4, %v73_v4  ;;  %v76_v7 = vmul.f32 %v74_v5, %v74_v5 }
  0x12   :  { %v86_v8 = vadd.f32 %v76_v7, %v75_v6 }
  0x14   :  { %110 = vadd.xlane.f32.xlu0 %v86_v8 }
  0x87   :  { %v111_v9 = vpop.xlane.xlu0 %110 }
  0x88   :  { %v112_v10 = vrot.slane %v111_v9, 4 }
  0x8a   :  { %v113_v11 = vadd.f32 %v112_v10, %v111_v9 }
  0x8c   :  { %v114_v12 = vrot.slane %v113_v11, 2 }
  0x8e   :  { %v115_v13 = vadd.f32 %v114_v12, %v113_v11 }
  0x90   :  { %v116_v14 = vrot.slane %v115_v13, 1 }
  0x92   :  { %v117_v15 = vadd.f32 %v116_v14, %v115_v13 }
  0x94   :  { %142 = vpush %v117_v15 }
  0xc5   :  { %s143_s22 = spop %142 }
  0xc6   :  { %120 = sst [smem:[#allocation8]] %s143_s22 }
  0xc7   :  { %129 = dma.smem_to_hbm %s219_s23, 16, %s127_s21, [#allocation5]  }
  0xc8   :  { %213 = dma.done.wait [#allocation5], 16  }
  0xc9   :  { %214 = vsyncadd [#allocation5], 4294967280 }
  0xca   :  { %134 = sfence }
  0xcb   :  { %135 = vsyncpa [#allocation4], 1 }
  0xcc   :  { %136 = vsyncpa [#allocation7], 1 }
  0xcd   :  { %137 = vsyncpa [#allocation5], 1 }

</bundles_post_ra>
